<compile_context>
chip_gen: v7x
topology: tpu7x:2x2x1
jax: 0.10.0
libtpu: 0.0.40
codegen_flags: <defaults>
</compile_context>

<pallas_src>
import functools

import jax
import jax.numpy as jnp
from jax.experimental import pallas as pl
from jax.experimental.pallas import tpu as pltpu


def _largest_divisor_leq(n, cap):
    cap = max(1, min(n, int(cap)))
    for d in range(cap, 0, -1):
        if n % d == 0:
            return d
    return 1


def _vmem_capacity_bytes():
    """Physical VMEM per TensorCore; conservative fallback if query fails."""
    try:
        cap = getattr(pltpu.get_tpu_info(), "vmem_capacity_bytes", None)
        if cap:
            return int(cap)
    except Exception:
        pass
    return 64 * 1024 * 1024  # v7x per-TC (smallest of v5e/v6e/v7x)


def _shave_dma_kernel(x_hbm, o_ref, copy_sem, *, s, h_out, w_out, p_blk):
    # Crop both H and W inside the DMA descriptor (long inner runs).
    # x_hbm: raw (P, H, W) ref in HBM; o_ref: (p_blk, h_out, w_out) VMEM block.
    p0 = pl.multiple_of(pl.program_id(0) * p_blk, p_blk)
    src = x_hbm.at[pl.ds(p0, p_blk), pl.ds(s, h_out), pl.ds(s, w_out)]
    cp = pltpu.make_async_copy(src, o_ref, copy_sem)
    cp.start()
    cp.wait()


def _shave_slab_kernel(x_hbm, o_ref, slab_ref, copy_sem, *, s, h_out, w_out,
                       w_full, p_blk):
    # Crop only H inside the DMA (keep full contiguous rows); crop W in VMEM.
    p0 = pl.multiple_of(pl.program_id(0) * p_blk, p_blk)
    src = x_hbm.at[pl.ds(p0, p_blk), pl.ds(s, h_out), pl.ds(0, w_full)]
    cp = pltpu.make_async_copy(src, slab_ref, copy_sem)
    cp.start()
    cp.wait()
    o_ref[...] = slab_ref[:, :, s:s + w_out]


def shave_block(x, s):
    """Equivalent of x[:, :, s:-s, s:-s] for NCHW input, computed in Pallas."""
    assert s >= 1, "s must be >= 1 (s == 0 means an empty crop in PyTorch semantics)"
    n, c, h, w = x.shape
    h_out, w_out = h - 2 * s, w - 2 * s
    assert h_out > 0 and w_out > 0, "crop too large for spatial dims"

    itemsize = jnp.dtype(x.dtype).itemsize
    p_total = n * c

    # Per-chip VMEM sizing.
    vmem_cap = _vmem_capacity_bytes()
    budget_bytes = min(vmem_cap * 2 // 5, 56 * 1024 * 1024)
    vmem_limit = min(max(vmem_cap - 8 * 1024 * 1024, 32 * 1024 * 1024),
                     100 * 1024 * 1024)

    # Short-inner-run guard: if cropped rows are tiny, read full rows instead.
    row_out_bytes = w_out * itemsize
    row_full_bytes = w * itemsize
    use_slab = (row_out_bytes < 512) and (row_full_bytes <= 4096)

    out_plane_bytes = h_out * w_out * itemsize
    slab_plane_bytes = h_out * w * itemsize if use_slab else 0
    # Double-buffered output block + (single-buffered) slab scratch.
    per_plane_bytes = 2 * out_plane_bytes + slab_plane_bytes

    p_cap_vmem = max(1, budget_bytes // per_plane_bytes)
    min_steps = 4 if p_total >= 4 else 1          # keep both v7x TCs busy
    p_blk = _largest_divisor_leq(p_total,
                                 min(p_cap_vmem, max(1, p_total // min_steps)))
    steps = p_total // p_blk

    x_flat = x.reshape(p_total, h, w)

    read_w = w if use_slab else w_out
    cost = pl.CostEstimate(
        flops=0,
        transcendentals=0,
        bytes_accessed=p_total * h_out * (read_w + w_out) * itemsize,
    )

    out_spec = pl.BlockSpec((p_blk, h_out, w_out), lambda i: (i, 0, 0))

    if use_slab:
        kernel = functools.partial(
            _shave_slab_kernel, s=s, h_out=h_out, w_out=w_out, w_full=w,
            p_blk=p_blk)
        scratch_shapes = [
            pltpu.VMEM((p_blk, h_out, w), x.dtype),
            pltpu.SemaphoreType.DMA(()),
        ]
    else:
        kernel = functools.partial(
            _shave_dma_kernel, s=s, h_out=h_out, w_out=w_out, p_blk=p_blk)
        scratch_shapes = [pltpu.SemaphoreType.DMA(())]

    out_flat = pl.pallas_call(
        kernel,
        out_shape=jax.ShapeDtypeStruct((p_total, h_out, w_out), x.dtype),
        grid_spec=pltpu.PrefetchScalarGridSpec(
            num_scalar_prefetch=0,
            grid=(steps,),
            in_specs=[
                # Raw HBM ref; the kernel DMAs the cropped window itself.
                pl.BlockSpec(memory_space=pl.ANY),
            ],
            out_specs=out_spec,
            scratch_shapes=scratch_shapes,
        ),
        compiler_params=pltpu.CompilerParams(
            dimension_semantics=("parallel",),
            vmem_limit_bytes=int(vmem_limit),
        ),
        cost_estimate=cost,
    )(x_flat)

    return out_flat.reshape(n, c, h_out, w_out)


if __name__ == "__main__":
    key = jax.random.PRNGKey(0)
    # Small NCHW input consistent with the module's forward.
    x = jax.random.normal(key, (2, 4, 16, 16), dtype=jnp.float32)
    s = 2

    out = shave_block(x, s)
    out = jax.block_until_ready(out)

    # Reference check against plain JAX slicing (same semantics as PyTorch).
    ref = x[:, :, s:-s, s:-s]
    assert out.shape == ref.shape, (out.shape, ref.shape)
    assert jnp.array_equal(out, ref), "mismatch vs reference slice"

    print("KERNEL_OK")
</pallas_src>

<mosaic_0001>
module attributes {stable_mosaic.version = 11 : i64} {
  func.func @_shave_slab_kernel(%arg0: i32, %arg1: memref<8x16x16xf32, #tpu.memory_space<any>>, %arg2: memref<2x12x12xf32, #tpu.memory_space<vmem>>, %arg3: memref<2x12x16xf32, #tpu.memory_space<vmem>>, %arg4: memref<!tpu.dma_semaphore, #tpu.memory_space<semaphore_mem>>) attributes {dimension_semantics = [#tpu.dimension_semantics<parallel>], iteration_bounds = array<i64: 4>, scalar_prefetch = 0 : i64, scratch_operands = 2 : i64, tpu.core_type = #tpu.core_type<tc>, window_params = [{}, {transform_indices = @transform_1, window_bounds = array<i64: 2, 12, 12>}]} {
    %c2_i32 = arith.constant 2 : i32
    %0 = arith.muli %arg0, %c2_i32 : i32
    %1 = tpu.assume_multiple %0, 2 : i32
    %c2_i32_0 = arith.constant 2 : i32
    %c0_i32 = arith.constant 0 : i32
    %2 = tpu.memref_slice %arg1[%1, %c2_i32_0, %c0_i32] : memref<8x16x16xf32, #tpu.memory_space<any>> -> memref<2x12x16xf32, #tpu.memory_space<any>>
    tpu.enqueue_dma source(%2 : memref<2x12x16xf32, #tpu.memory_space<any>>) target(%arg3 : memref<2x12x16xf32, #tpu.memory_space<vmem>>) target_semaphore(%arg4 : memref<!tpu.dma_semaphore, #tpu.memory_space<semaphore_mem>>)
    %c2_i32_1 = arith.constant 2 : i32
    %c0_i32_2 = arith.constant 0 : i32
    %3 = tpu.memref_slice %arg1[%1, %c2_i32_1, %c0_i32_2] : memref<8x16x16xf32, #tpu.memory_space<any>> -> memref<2x12x16xf32, #tpu.memory_space<any>>
    tpu.wait_dma2 semaphore(%arg4 : memref<!tpu.dma_semaphore, #tpu.memory_space<semaphore_mem>>) src(%3 : memref<2x12x16xf32, #tpu.memory_space<any>>) dst(%arg3 : memref<2x12x16xf32, #tpu.memory_space<vmem>>)
    %c0 = arith.constant 0 : index
    %c0_3 = arith.constant 0 : index
    %c2 = arith.constant 2 : index
    %4 = vector.load %arg3[%c0, %c0_3, %c2] : memref<2x12x16xf32, #tpu.memory_space<vmem>>, vector<2x12x12xf32>
    %c0_4 = arith.constant 0 : index
    %c0_5 = arith.constant 0 : index
    %c0_6 = arith.constant 0 : index
    %5 = vector.load %arg2[%c0_4, %c0_5, %c0_6] : memref<2x12x12xf32, #tpu.memory_space<vmem>>, vector<2x12x12xf32>
    tpu.vector_store %arg2[%c0_4, %c0_5, %c0_6], %4 {strides = array<i32>} : memref<2x12x12xf32, #tpu.memory_space<vmem>>, vector<2x12x12xf32>,
    return
  }
  func.func @transform_1(%arg0: i32) -> (i32, i32, i32) {
    %c0_i32 = arith.constant 0 : i32
    %c0_i32_0 = arith.constant 0 : i32
    %c0_i32_1 = arith.constant 0 : i32
    return %arg0, %c0_i32, %c0_i32_0 : i32, i32, i32
  }
}

</mosaic_0001>

<bundles_post_ra>
// kernel: tpu_custom_call.1
= control target key start
LH: loop header
LB: loop body
LE: loop exit
PB: predicated region body
PF: predicated region fallthrough
CT: control target
= control target key end

     0   :  { %s219_s6 = smov 0   ;;  %s254_s0 = inlined_call_operand.hbm [shape: f32[8,16,16], index: 0, kind: input, shape index: {}]   ;;  %s255_s1 = inlined_call_operand.vmem [shape: f32[8,12,12], index: 1, kind: output, shape index: {}]  }
   0x1 LB: > { %p147_p0 = scmp.ge.s32.totalorder %s203_s6, 4  ;;  %s203_s6 = sphi %s219_s6, %s11_s6  }
   0x2   : > { %s148_s7 = sshll.u32 (!%p147_p0), %s203_s6, 1  ;;  %s157_s8 = sshll.u32 (!%p147_p0), %s203_s6, 9 }
   0x3   : > { %36 = sbr.rel (%p147_p0) target bundleno = 150 (0x96), region = 12  ;;  %p46_p1 = scmp.lt.s32.totalorder (!%p147_p0), %s148_s7, 7 }
   0x4   : > { %s128_s11 = scalar_lea.hbm (!%p147_p0), %s254_s0, %s157_s8  ;;  %s205_s13 = smov (!%p147_p0), [#allocation2]  }
   0x5   : > { %s230_s12 = scalar_lea.hbm (!%p147_p0), %s128_s11, 32  ;;  %s58_s14 = sshll.u32 (!%p147_p0), %s205_s13, 4  ;;  %s59_s14 = int_to_ptr.vmem [resolvable:$true] %s58_s14 }
   0x6   : > { %s194_s19 = scalar_lea.hbm (!%p147_p0), %s128_s11, 416  ;;  %s172_s22 = scalar_lea.hbm (!%p147_p0), %s254_s0, 2048 }
   0x7   : > { %p171_p2 = scmp.ne.s32.totalorder (!%p147_p0), %s230_s12, %s194_s19  ;;  %p173_p3 = scmp.lt.u32.totalorder (!%p147_p0), %s230_s12, %s254_s0 }
   0x8   : > { %p174_p4 = scmp.lt.u32.totalorder (!%p147_p0), %s172_s22, %s194_s19  ;;  %p176_p6 = scmp.lt.u32.totalorder (!%p147_p0), %s194_s19, %s230_s12 }
   0xa   : > { %s257_s7 = smov (!%p46_p1, %s148_s7), 7  ;;  %p175_p5 = por %p174_p4, %p173_p3 }
   0xb   : > { %s156_s15 = sshll.u32 %s257_s7, 4 }
   0xc   : > { %s235_s18 = scalar_lea.vmem %s255_s1, %s156_s15  ;;  %p177_p7 = por %p176_p6, %p175_p5 }
   0xe   : > { %p178_p8 = pnand %p177_p7, %p171_p2 }
  0x10   : > { %181 = shalt.err (!%p178_p8)  }
  0x11   : > { %s182_s25 = scalar_lea.vmem %s59_s14, 384  ;;  %s186_s26 = scalar_lea.vmem %s59_s14, 512 }
  0x12   : > { %p183_p9 = scmp.ne.s32.totalorder %s59_s14, %s182_s25  ;;  %p187_p10 = scmp.lt.s32.totalorder %s59_s14, %s59_s14 }
  0x13   : > { %p188_p11 = scmp.lt.s32.totalorder %s186_s26, %s182_s25 }
  0x15   : > { %p189_p12 = por %p188_p11, %p187_p10 }
  0x17   : > { %p190_p13 = pnand %p189_p12, %p183_p9 }
  0x19   : > { %193 = shalt.err (!%p190_p13)  }
  0x1a   : > { %s206_s27 = smov 256   ;;  %s207_s28 = smov 12  }
  0x1b   : > { %61 = dma.hbm_to_vmem [thread:$0]  %s230_s12, 384, %s59_s14, [#allocation3], %s206_s27, %s206_s27, %s207_s28 }
  0x1c   : > { %199 = dma.done.wait [#allocation3], 384 }
  0x1d   : > { %200 = vsyncadd [#allocation3], 4294966912  ;;  %v66_v0 = vld [vmem:[#allocation2] sm:$0xff]  ;;  %v68_v1 = vld [vmem:[#allocation2 + $0x10] sm:$0xff]  ;;  %s208_s29 = smov 126   ;;  %vm86_vm0 = vcmask 97280  }
  0x1e   : > { %74 = vrot.lane.b32.xlu0 %v66_v0, %s208_s29  ;;  %78 = vrot.lane.b32.xlu1 %v68_v1, %s208_s29  ;;  %v67_v2 = vld [vmem:[#allocation2 + $0x8] sm:$0xf]  ;;  %v69_v3 = vld [vmem:[#allocation2 + $0x18] sm:$0xf]  ;;  %vm88_vm1 = vcmask 93184  }
  0x22   : > { %76 = vrot.lane.b32.xlu0 %v67_v2, %s208_s29  ;;  %80 = vrot.lane.b32.xlu1 %v69_v3, %s208_s29 }
  0x90   : > { %v75_v4 = vpop.permute.xlu0 %74  ;;  %v79_v5 = vpop.permute.xlu1 %78 }
  0x91   : > { %87 = vst.msk [vmem:[%s235_s18] sm:$0xff] %vm86_vm0, %v75_v4  ;;  %90 = vst.msk [vmem:[%s235_s18 + $0x10] sm:$0xff] %vm86_vm0, %v79_v5 }
  0x94   : > { %v77_v6 = vpop.permute.xlu0 %76  ;;  %v81_v7 = vpop.permute.xlu1 %80 }
  0x95   : > { %89 = vst.msk [vmem:[%s235_s18 + $0x8] sm:$0xf] %vm88_vm1, %v77_v6  ;;  %91 = vst.msk [vmem:[%s235_s18 + $0x18] sm:$0xf] %vm88_vm1, %v81_v7 }
  0x96 PF: > { %s11_s6 = sadd.s32 1, %s203_s6  }
  0x97   : > { %p8_p0 = scmp.ge.s32.totalorder %s11_s6, 5  }
  0x99   :  { %10 = sbr.rel (!%p8_p0) target bundleno = 1 (0x1), region = 40 }
  0xa0   :  { %116 = vsyncmov [#allocation3] }
  0xa3   :  { %s117_s30 = vpop.sfrf %116 }
  0xa4   :  { %p155_p1 = scmp.ne.s32.totalorder %s117_s30, 0 }
  0xa6   :  { %121 = shalt.err (%p155_p1)  }

</bundles_post_ra>
